<compile_context>
chip_gen: v7x
topology: tpu7x:2x2x1
jax: 0.10.0
libtpu: 0.0.40
codegen_flags: <defaults>
</compile_context>

<pallas_src>
import functools
import math

import jax
import jax.numpy as jnp
from jax.experimental import pallas as pl
from jax.experimental.pallas import tpu as pltpu


def _bitonic_sort_axis0(arrs, n):
    """Sort each (n, P) array in `arrs` ascending along axis 0 (sublanes).

    `n` must be a power of two. Fully unrolled at trace time; the shared
    compare-exchange masks are reused across all arrays in `arrs`.
    """
    shape = arrs[0].shape
    idx = jax.lax.broadcasted_iota(jnp.int32, shape, 0)
    k = 2
    while k <= n:
        j = k // 2
        while j >= 1:
            lower = (idx & j) == 0        # element is the low half of its pair
            ascend = (idx & k) == 0       # its block is sorted ascending
            take_min = lower == ascend
            new_arrs = []
            for a in arrs:
                fwd = pltpu.roll(a, shift=n - j, axis=0)   # fwd[i] = a[(i + j) % n]
                bwd = pltpu.roll(a, shift=j, axis=0)       # bwd[i] = a[(i - j) % n]
                partner = jnp.where(lower, fwd, bwd)
                new_arrs.append(
                    jnp.where(take_min,
                              jnp.minimum(a, partner),
                              jnp.maximum(a, partner)))
            arrs = new_arrs
            j //= 2
        k *= 2
    return arrs


def _swd_kernel(w_ref, x_ref, out_ref, *, n_true, n_pad):
    # w_ref   : (P, F)         f32  projection matrix (lane-dense on F)
    # x_ref   : (2*n_pad, F)   f32  [real_padded ; fake_padded], lane-dense
    # out_ref : (1, 1)         f32  scalar SWD
    w = w_ref[...]
    x = x_ref[...]
    p = w.shape[0]

    # Single fused MXU pass: contract over F on both operands -> (2*n_pad, P),
    # i.e. samples on sublanes, projections on lanes.
    t = jax.lax.dot_general(
        x, w,
        dimension_numbers=(((1,), (1,)), ((), ())),
        preferred_element_type=jnp.float32)

    t1 = t[:n_pad]      # (n_pad, P)  projected real samples
    t2 = t[n_pad:]      # (n_pad, P)  projected fake samples

    if n_pad != n_true:
        # Sentinel-pad AFTER projection so padded rows sort to the end of both
        # tensors in identical positions (diff == 0 exactly).
        row = jax.lax.broadcasted_iota(jnp.int32, (n_pad, p), 0)
        big = jnp.float32(3.0e38)
        valid = row < n_true
        t1 = jnp.where(valid, t1, big)
        t2 = jnp.where(valid, t2, big)

    # Sort both tensors along the sample (sublane) axis with one shared
    # bitonic network (6 stages for n_pad = 8), fully unrolled.
    t1s, t2s = _bitonic_sort_axis0([t1, t2], n_pad)

    d = t1s - t2s
    rowsum = jnp.sum(d * d, axis=1, keepdims=True)     # (n_pad, 1)
    total = jnp.sum(rowsum, axis=0, keepdims=True)     # (1, 1)
    out_ref[...] = jnp.sqrt(total * jnp.float32(1.0 / (p * n_true)))


@jax.jit
def sliced_wasserstein_distance(w, real_data, fake_data):
    """w: (P, F); real_data / fake_data: NCHW with equal batch sizes."""
    n = real_data.shape[0]
    assert fake_data.shape[0] == n, (
        "equal batch sizes only")  # TODO(synk): host-side random subsampling
    p, f = w.shape

    x1 = real_data.reshape(n, -1).astype(jnp.float32)   # (N, F), lane-dense
    x2 = fake_data.reshape(n, -1).astype(jnp.float32)   # (N, F), lane-dense
    assert x1.shape[1] == f

    # Pad the sample axis to a power of two (>= 8 sublanes) for the bitonic
    # network; padded feature rows are zeros (sentinel applied post-projection
    # inside the kernel).
    n_pad = max(8, 1 << int(math.ceil(math.log2(n))))
    if n_pad != n:
        pad = jnp.zeros((n_pad - n, f), jnp.float32)
        x1 = jnp.concatenate([x1, pad], axis=0)
        x2 = jnp.concatenate([x2, pad], axis=0)

    # Stack real & fake so the kernel does a single projection matmul.
    xall = jnp.concatenate([x1, x2], axis=0)             # (2*n_pad, F)

    kernel = functools.partial(_swd_kernel, n_true=n, n_pad=n_pad)
    out = pl.pallas_call(
        kernel,
        out_shape=jax.ShapeDtypeStruct((1, 1), jnp.float32),
        in_specs=[
            pl.BlockSpec(memory_space=pltpu.MemorySpace.VMEM),
            pl.BlockSpec(memory_space=pltpu.MemorySpace.VMEM),
        ],
        out_specs=pl.BlockSpec(memory_space=pltpu.MemorySpace.VMEM),
    )(w.astype(jnp.float32), xall)
    # TODO(synk): if P grows beyond ~128, add a parallel grid over P blocks
    # (dimension_semantics=("parallel",)) to use both v7x TensorCores.
    return out[0, 0]


def _reference(w, real_data, fake_data):
    n = real_data.shape[0]
    x1 = real_data.reshape(n, -1).astype(jnp.float32)
    x2 = fake_data.reshape(n, -1).astype(jnp.float32)
    t1 = jnp.sort(w @ x1.T, axis=-1)
    t2 = jnp.sort(w @ x2.T, axis=-1)
    return jnp.sqrt(jnp.mean((t1 - t2) ** 2))


if __name__ == "__main__":
    key = jax.random.PRNGKey(0)
    k_w, k_r, k_f = jax.random.split(key, 3)

    batch, c, h, wd = 8, 4, 16, 16            # NCHW inputs
    n_features = c * h * wd                    # 1024
    n_projections = 64

    # Deterministic stand-in for np.random.normal(size=(P, F)).
    w_transform = jax.random.normal(k_w, (n_projections, n_features),
                                    dtype=jnp.float32)
    real = jax.random.normal(k_r, (batch, c, h, wd), dtype=jnp.float32)
    fake = jax.random.normal(k_f, (batch, c, h, wd), dtype=jnp.float32)

    dist = sliced_wasserstein_distance(w_transform, real, fake)
    dist = jax.block_until_ready(dist)

    ref = _reference(w_transform, real, fake)
    assert jnp.allclose(dist, ref, rtol=1e-3, atol=1e-3), (dist, ref)

    print("KERNEL_OK")
</pallas_src>

<mosaic_0001>
module attributes {stable_mosaic.version = 11 : i64} {
  func.func @_swd_kernel(%arg0: memref<64x1024xf32, #tpu.memory_space<vmem>>, %arg1: memref<16x1024xf32, #tpu.memory_space<vmem>>, %arg2: memref<1x1xf32, #tpu.memory_space<vmem>>) attributes {dimension_semantics = [], scalar_prefetch = 0 : i64, scratch_operands = 0 : i64, tpu.core_type = #tpu.core_type<tc>} {
    %c0 = arith.constant 0 : index
    %c0_0 = arith.constant 0 : index
    %0 = vector.load %arg0[%c0, %c0_0] : memref<64x1024xf32, #tpu.memory_space<vmem>>, vector<64x1024xf32>
    %c0_1 = arith.constant 0 : index
    %c0_2 = arith.constant 0 : index
    %1 = vector.load %arg1[%c0_1, %c0_2] : memref<16x1024xf32, #tpu.memory_space<vmem>>, vector<16x1024xf32>
    %cst = arith.constant dense<0.000000e+00> : vector<16x64xf32>
    %2 = tpu.matmul %1, %0, %cst {dimension_numbers = #tpu.dot_dimension_numbers<[1], [1], [0], [0], [0, 0, 1, 0], [], []>} : vector<16x1024xf32>, vector<64x1024xf32>, vector<16x64xf32> -> vector<16x64xf32>
    %3 = vector.extract_strided_slice %2 {offsets = [0, 0], sizes = [8, 64], strides = [1, 1]} : vector<16x64xf32> to vector<8x64xf32>
    %4 = vector.extract_strided_slice %2 {offsets = [8, 0], sizes = [8, 64], strides = [1, 1]} : vector<16x64xf32> to vector<8x64xf32>
    %5 = tpu.iota {dimensions = array<i32: 0>} : vector<8x64xi32>
    %c1_i32 = arith.constant 1 : i32
    %6 = vector.broadcast %c1_i32 : i32 to vector<8x64xi32>
    %7 = arith.andi %5, %6 : vector<8x64xi32>
    %c0_i32 = arith.constant 0 : i32
    %8 = vector.broadcast %c0_i32 : i32 to vector<8x64xi32>
    %9 = arith.cmpi eq, %7, %8 : vector<8x64xi32>
    %c2_i32 = arith.constant 2 : i32
    %10 = vector.broadcast %c2_i32 : i32 to vector<8x64xi32>
    %11 = arith.andi %5, %10 : vector<8x64xi32>
    %c0_i32_3 = arith.constant 0 : i32
    %12 = vector.broadcast %c0_i32_3 : i32 to vector<8x64xi32>
    %13 = arith.cmpi eq, %11, %12 : vector<8x64xi32>
    %14 = arith.xori %9, %13 : vector<8x64xi1>
    %cst_4 = arith.constant dense<true> : vector<8x64xi1>
    %15 = arith.xori %14, %cst_4 : vector<8x64xi1>
    %c7_i32 = arith.constant 7 : i32
    %16 = tpu.dynamic_rotate %3 by %c7_i32 dim 0 : vector<8x64xf32>, i32 -> vector<8x64xf32>
    %c1_i32_5 = arith.constant 1 : i32
    %17 = tpu.dynamic_rotate %3 by %c1_i32_5 dim 0 : vector<8x64xf32>, i32 -> vector<8x64xf32>
    %18 = arith.select %9, %16, %17 : vector<8x64xi1>, vector<8x64xf32>
    %19 = arith.minimumf %3, %18 : vector<8x64xf32>
    %20 = arith.maximumf %3, %18 : vector<8x64xf32>
    %21 = arith.select %15, %19, %20 : vector<8x64xi1>, vector<8x64xf32>
    %c7_i32_6 = arith.constant 7 : i32
    %22 = tpu.dynamic_rotate %4 by %c7_i32_6 dim 0 : vector<8x64xf32>, i32 -> vector<8x64xf32>
    %c1_i32_7 = arith.constant 1 : i32
    %23 = tpu.dynamic_rotate %4 by %c1_i32_7 dim 0 : vector<8x64xf32>, i32 -> vector<8x64xf32>
    %24 = arith.select %9, %22, %23 : vector<8x64xi1>, vector<8x64xf32>
    %25 = arith.minimumf %4, %24 : vector<8x64xf32>
    %26 = arith.maximumf %4, %24 : vector<8x64xf32>
    %27 = arith.select %15, %25, %26 : vector<8x64xi1>, vector<8x64xf32>
    %c2_i32_8 = arith.constant 2 : i32
    %28 = vector.broadcast %c2_i32_8 : i32 to vector<8x64xi32>
    %29 = arith.andi %5, %28 : vector<8x64xi32>
    %c0_i32_9 = arith.constant 0 : i32
    %30 = vector.broadcast %c0_i32_9 : i32 to vector<8x64xi32>
    %31 = arith.cmpi eq, %29, %30 : vector<8x64xi32>
    %c4_i32 = arith.constant 4 : i32
    %32 = vector.broadcast %c4_i32 : i32 to vector<8x64xi32>
    %33 = arith.andi %5, %32 : vector<8x64xi32>
    %c0_i32_10 = arith.constant 0 : i32
    %34 = vector.broadcast %c0_i32_10 : i32 to vector<8x64xi32>
    %35 = arith.cmpi eq, %33, %34 : vector<8x64xi32>
    %36 = arith.xori %31, %35 : vector<8x64xi1>
    %cst_11 = arith.constant dense<true> : vector<8x64xi1>
    %37 = arith.xori %36, %cst_11 : vector<8x64xi1>
    %c6_i32 = arith.constant 6 : i32
    %38 = tpu.dynamic_rotate %21 by %c6_i32 dim 0 : vector<8x64xf32>, i32 -> vector<8x64xf32>
    %c2_i32_12 = arith.constant 2 : i32
    %39 = tpu.dynamic_rotate %21 by %c2_i32_12 dim 0 : vector<8x64xf32>, i32 -> vector<8x64xf32>
    %40 = arith.select %31, %38, %39 : vector<8x64xi1>, vector<8x64xf32>
    %41 = arith.minimumf %21, %40 : vector<8x64xf32>
    %42 = arith.maximumf %21, %40 : vector<8x64xf32>
    %43 = arith.select %37, %41, %42 : vector<8x64xi1>, vector<8x64xf32>
    %c6_i32_13 = arith.constant 6 : i32
    %44 = tpu.dynamic_rotate %27 by %c6_i32_13 dim 0 : vector<8x64xf32>, i32 -> vector<8x64xf32>
    %c2_i32_14 = arith.constant 2 : i32
    %45 = tpu.dynamic_rotate %27 by %c2_i32_14 dim 0 : vector<8x64xf32>, i32 -> vector<8x64xf32>
    %46 = arith.select %31, %44, %45 : vector<8x64xi1>, vector<8x64xf32>
    %47 = arith.minimumf %27, %46 : vector<8x64xf32>
    %48 = arith.maximumf %27, %46 : vector<8x64xf32>
    %49 = arith.select %37, %47, %48 : vector<8x64xi1>, vector<8x64xf32>
    %c1_i32_15 = arith.constant 1 : i32
    %50 = vector.broadcast %c1_i32_15 : i32 to vector<8x64xi32>
    %51 = arith.andi %5, %50 : vector<8x64xi32>
    %c0_i32_16 = arith.constant 0 : i32
    %52 = vector.broadcast %c0_i32_16 : i32 to vector<8x64xi32>
    %53 = arith.cmpi eq, %51, %52 : vector<8x64xi32>
    %c4_i32_17 = arith.constant 4 : i32
    %54 = vector.broadcast %c4_i32_17 : i32 to vector<8x64xi32>
    %55 = arith.andi %5, %54 : vector<8x64xi32>
    %c0_i32_18 = arith.constant 0 : i32
    %56 = vector.broadcast %c0_i32_18 : i32 to vector<8x64xi32>
    %57 = arith.cmpi eq, %55, %56 : vector<8x64xi32>
    %58 = arith.xori %53, %57 : vector<8x64xi1>
    %cst_19 = arith.constant dense<true> : vector<8x64xi1>
    %59 = arith.xori %58, %cst_19 : vector<8x64xi1>
    %c7_i32_20 = arith.constant 7 : i32
    %60 = tpu.dynamic_rotate %43 by %c7_i32_20 dim 0 : vector<8x64xf32>, i32 -> vector<8x64xf32>
    %c1_i32_21 = arith.constant 1 : i32
    %61 = tpu.dynamic_rotate %43 by %c1_i32_21 dim 0 : vector<8x64xf32>, i32 -> vector<8x64xf32>
    %62 = arith.select %53, %60, %61 : vector<8x64xi1>, vector<8x64xf32>
    %63 = arith.minimumf %43, %62 : vector<8x64xf32>
    %64 = arith.maximumf %43, %62 : vector<8x64xf32>
    %65 = arith.select %59, %63, %64 : vector<8x64xi1>, vector<8x64xf32>
    %c7_i32_22 = arith.constant 7 : i32
    %66 = tpu.dynamic_rotate %49 by %c7_i32_22 dim 0 : vector<8x64xf32>, i32 -> vector<8x64xf32>
    %c1_i32_23 = arith.constant 1 : i32
    %67 = tpu.dynamic_rotate %49 by %c1_i32_23 dim 0 : vector<8x64xf32>, i32 -> vector<8x64xf32>
    %68 = arith.select %53, %66, %67 : vector<8x64xi1>, vector<8x64xf32>
    %69 = arith.minimumf %49, %68 : vector<8x64xf32>
    %70 = arith.maximumf %49, %68 : vector<8x64xf32>
    %71 = arith.select %59, %69, %70 : vector<8x64xi1>, vector<8x64xf32>
    %c4_i32_24 = arith.constant 4 : i32
    %72 = vector.broadcast %c4_i32_24 : i32 to vector<8x64xi32>
    %73 = arith.andi %5, %72 : vector<8x64xi32>
    %c0_i32_25 = arith.constant 0 : i32
    %74 = vector.broadcast %c0_i32_25 : i32 to vector<8x64xi32>
    %75 = arith.cmpi eq, %73, %74 : vector<8x64xi32>
    %c8_i32 = arith.constant 8 : i32
    %76 = vector.broadcast %c8_i32 : i32 to vector<8x64xi32>
    %77 = arith.andi %5, %76 : vector<8x64xi32>
    %c0_i32_26 = arith.constant 0 : i32
    %78 = vector.broadcast %c0_i32_26 : i32 to vector<8x64xi32>
    %79 = arith.cmpi eq, %77, %78 : vector<8x64xi32>
    %80 = arith.xori %75, %79 : vector<8x64xi1>
    %cst_27 = arith.constant dense<true> : vector<8x64xi1>
    %81 = arith.xori %80, %cst_27 : vector<8x64xi1>
    %c4_i32_28 = arith.constant 4 : i32
    %82 = tpu.dynamic_rotate %65 by %c4_i32_28 dim 0 : vector<8x64xf32>, i32 -> vector<8x64xf32>
    %c4_i32_29 = arith.constant 4 : i32
    %83 = tpu.dynamic_rotate %65 by %c4_i32_29 dim 0 : vector<8x64xf32>, i32 -> vector<8x64xf32>
    %84 = arith.select %75, %82, %83 : vector<8x64xi1>, vector<8x64xf32>
    %85 = arith.minimumf %65, %84 : vector<8x64xf32>
    %86 = arith.maximumf %65, %84 : vector<8x64xf32>
    %87 = arith.select %81, %85, %86 : vector<8x64xi1>, vector<8x64xf32>
    %c4_i32_30 = arith.constant 4 : i32
    %88 = tpu.dynamic_rotate %71 by %c4_i32_30 dim 0 : vector<8x64xf32>, i32 -> vector<8x64xf32>
    %c4_i32_31 = arith.constant 4 : i32
    %89 = tpu.dynamic_rotate %71 by %c4_i32_31 dim 0 : vector<8x64xf32>, i32 -> vector<8x64xf32>
    %90 = arith.select %75, %88, %89 : vector<8x64xi1>, vector<8x64xf32>
    %91 = arith.minimumf %71, %90 : vector<8x64xf32>
    %92 = arith.maximumf %71, %90 : vector<8x64xf32>
    %93 = arith.select %81, %91, %92 : vector<8x64xi1>, vector<8x64xf32>
    %c2_i32_32 = arith.constant 2 : i32
    %94 = vector.broadcast %c2_i32_32 : i32 to vector<8x64xi32>
    %95 = arith.andi %5, %94 : vector<8x64xi32>
    %c0_i32_33 = arith.constant 0 : i32
    %96 = vector.broadcast %c0_i32_33 : i32 to vector<8x64xi32>
    %97 = arith.cmpi eq, %95, %96 : vector<8x64xi32>
    %c8_i32_34 = arith.constant 8 : i32
    %98 = vector.broadcast %c8_i32_34 : i32 to vector<8x64xi32>
    %99 = arith.andi %5, %98 : vector<8x64xi32>
    %c0_i32_35 = arith.constant 0 : i32
    %100 = vector.broadcast %c0_i32_35 : i32 to vector<8x64xi32>
    %101 = arith.cmpi eq, %99, %100 : vector<8x64xi32>
    %102 = arith.xori %97, %101 : vector<8x64xi1>
    %cst_36 = arith.constant dense<true> : vector<8x64xi1>
    %103 = arith.xori %102, %cst_36 : vector<8x64xi1>
    %c6_i32_37 = arith.constant 6 : i32
    %104 = tpu.dynamic_rotate %87 by %c6_i32_37 dim 0 : vector<8x64xf32>, i32 -> vector<8x64xf32>
    %c2_i32_38 = arith.constant 2 : i32
    %105 = tpu.dynamic_rotate %87 by %c2_i32_38 dim 0 : vector<8x64xf32>, i32 -> vector<8x64xf32>
    %106 = arith.select %97, %104, %105 : vector<8x64xi1>, vector<8x64xf32>
    %107 = arith.minimumf %87, %106 : vector<8x64xf32>
    %108 = arith.maximumf %87, %106 : vector<8x64xf32>
    %109 = arith.select %103, %107, %108 : vector<8x64xi1>, vector<8x64xf32>
    %c6_i32_39 = arith.constant 6 : i32
    %110 = tpu.dynamic_rotate %93 by %c6_i32_39 dim 0 : vector<8x64xf32>, i32 -> vector<8x64xf32>
    %c2_i32_40 = arith.constant 2 : i32
    %111 = tpu.dynamic_rotate %93 by %c2_i32_40 dim 0 : vector<8x64xf32>, i32 -> vector<8x64xf32>
    %112 = arith.select %97, %110, %111 : vector<8x64xi1>, vector<8x64xf32>
    %113 = arith.minimumf %93, %112 : vector<8x64xf32>
    %114 = arith.maximumf %93, %112 : vector<8x64xf32>
    %115 = arith.select %103, %113, %114 : vector<8x64xi1>, vector<8x64xf32>
    %c1_i32_41 = arith.constant 1 : i32
    %116 = vector.broadcast %c1_i32_41 : i32 to vector<8x64xi32>
    %117 = arith.andi %5, %116 : vector<8x64xi32>
    %c0_i32_42 = arith.constant 0 : i32
    %118 = vector.broadcast %c0_i32_42 : i32 to vector<8x64xi32>
    %119 = arith.cmpi eq, %117, %118 : vector<8x64xi32>
    %c8_i32_43 = arith.constant 8 : i32
    %120 = vector.broadcast %c8_i32_43 : i32 to vector<8x64xi32>
    %121 = arith.andi %5, %120 : vector<8x64xi32>
    %c0_i32_44 = arith.constant 0 : i32
    %122 = vector.broadcast %c0_i32_44 : i32 to vector<8x64xi32>
    %123 = arith.cmpi eq, %121, %122 : vector<8x64xi32>
    %124 = arith.xori %119, %123 : vector<8x64xi1>
    %cst_45 = arith.constant dense<true> : vector<8x64xi1>
    %125 = arith.xori %124, %cst_45 : vector<8x64xi1>
    %c7_i32_46 = arith.constant 7 : i32
    %126 = tpu.dynamic_rotate %109 by %c7_i32_46 dim 0 : vector<8x64xf32>, i32 -> vector<8x64xf32>
    %c1_i32_47 = arith.constant 1 : i32
    %127 = tpu.dynamic_rotate %109 by %c1_i32_47 dim 0 : vector<8x64xf32>, i32 -> vector<8x64xf32>
    %128 = arith.select %119, %126, %127 : vector<8x64xi1>, vector<8x64xf32>
    %129 = arith.minimumf %109, %128 : vector<8x64xf32>
    %130 = arith.maximumf %109, %128 : vector<8x64xf32>
    %131 = arith.select %125, %129, %130 : vector<8x64xi1>, vector<8x64xf32>
    %c7_i32_48 = arith.constant 7 : i32
    %132 = tpu.dynamic_rotate %115 by %c7_i32_48 dim 0 : vector<8x64xf32>, i32 -> vector<8x64xf32>
    %c1_i32_49 = arith.constant 1 : i32
    %133 = tpu.dynamic_rotate %115 by %c1_i32_49 dim 0 : vector<8x64xf32>, i32 -> vector<8x64xf32>
    %134 = arith.select %119, %132, %133 : vector<8x64xi1>, vector<8x64xf32>
    %135 = arith.minimumf %115, %134 : vector<8x64xf32>
    %136 = arith.maximumf %115, %134 : vector<8x64xf32>
    %137 = arith.select %125, %135, %136 : vector<8x64xi1>, vector<8x64xf32>
    %138 = arith.subf %131, %137 : vector<8x64xf32>
    %139 = arith.mulf %138, %138 : vector<8x64xf32>
    %cst_50 = arith.constant dense<0.000000e+00> : vector<8xf32>
    %140 = vector.multi_reduction <add>, %139, %cst_50 [1] : vector<8x64xf32> to vector<8xf32>
    %141 = vector.shape_cast %140 : vector<8xf32> to vector<8x1xf32>
    %cst_51 = arith.constant dense<0.000000e+00> : vector<1xf32>
    %142 = vector.multi_reduction <add>, %141, %cst_51 [0] : vector<8x1xf32> to vector<1xf32>
    %143 = vector.shape_cast %142 : vector<1xf32> to vector<1x1xf32>
    %cst_52 = arith.constant 0.001953125 : f32
    %144 = vector.broadcast %cst_52 : f32 to vector<1x1xf32>
    %145 = arith.mulf %143, %144 : vector<1x1xf32>
    %146 = math.sqrt %145 : vector<1x1xf32>
    %c0_53 = arith.constant 0 : index
    %c0_54 = arith.constant 0 : index
    %147 = vector.load %arg2[%c0_53, %c0_54] : memref<1x1xf32, #tpu.memory_space<vmem>>, vector<1x1xf32>
    tpu.vector_store %arg2[%c0_53, %c0_54], %146 {strides = array<i32>} : memref<1x1xf32, #tpu.memory_space<vmem>>, vector<1x1xf32>,
    return
  }
}

</mosaic_0001>

<bundles_post_ra>
// kernel: sliced_wasserstein_distance.1
= control target key start
LH: loop header
LB: loop body
LE: loop exit
PB: predicated region body
PF: predicated region fallthrough
CT: control target
= control target key end

     0   :  { %s964_s0 = inlined_call_operand.vmem [shape: f32[64,1024], index: 0, kind: input, shape index: {}]   ;;  %s965_s1 = inlined_call_operand.vmem [shape: f32[16,1024], index: 1, kind: input, shape index: {}]   ;;  %s966_s2 = inlined_call_operand.hbm [shape: f32[1,1], index: 2, kind: output, shape index: {}]  }
   0x1   :  { %v13_v0 = vld [vmem:[%s964_s0 + $0x8] sm:$0xff]  ;;  %v12_v5 = vld [vmem:[%s964_s0] sm:$0xff]  ;;  %v15_v48 = vld [vmem:[%s964_s0 + $0x18] sm:$0xff] }
   0x2   :  { %v21_v1 = vld [vmem:[%s964_s0 + $0x48] sm:$0xff]  ;;  %v20_v6 = vld [vmem:[%s964_s0 + $0x40] sm:$0xff]  ;;  %v23_v49 = vld [vmem:[%s964_s0 + $0x58] sm:$0xff] }
   0x3   :  { %v17_v2 = vld [vmem:[%s964_s0 + $0x28] sm:$0xff]  ;;  %v518_v3 = vpack.c.bf16 %v21_v1, %v13_v0  ;;  %v520_v8 = vpack.c.bf16 %v20_v6, %v12_v5  ;;  %v16_v9 = vld [vmem:[%s964_s0 + $0x20] sm:$0xff]  ;;  %v19_v50 = vld [vmem:[%s964_s0 + $0x38] sm:$0xff]  ;;  %v534_v54 = vpack.c.bf16 %v23_v49, %v15_v48 }
   0x4   :  { %v25_v4 = vld [vmem:[%s964_s0 + $0x68] sm:$0xff]  ;;  %v24_v10 = vld [vmem:[%s964_s0 + $0x60] sm:$0xff]  ;;  %v27_v51 = vld [vmem:[%s964_s0 + $0x78] sm:$0xff] }
   0x5   :  { %v550_v7 = vpack.c.bf16 %v25_v4, %v17_v2  ;;  %v29_v11 = vld [vmem:[%s964_s0 + $0x88] sm:$0xff]  ;;  %519 = vmatprep.subr.bf16.mxu1 %v518_v3  ;;  %v552_v12 = vpack.c.bf16 %v24_v10, %v16_v9  ;;  %v28_v18 = vld [vmem:[%s964_s0 + $0x80] sm:$0xff]  ;;  %v566_v55 = vpack.c.bf16 %v27_v51, %v19_v50 }
   0x6   :  { %v37_v13 = vld [vmem:[%s964_s0 + $0xc8] sm:$0xff]  ;;  %521 = vmatpush1.bf16.xpose.msra.mxu1 %v520_v8  ;;  %v36_v19 = vld [vmem:[%s964_s0 + $0xc0] sm:$0xff] }
   0x7   :  { %v33_v14 = vld [vmem:[%s964_s0 + $0xa8] sm:$0xff]  ;;  %551 = vmatprep.subr.bf16.mxu0 %v550_v7  ;;  %v522_v16 = vpack.c.bf16 %v37_v13, %v29_v11  ;;  %v32_v20 = vld [vmem:[%s964_s0 + $0xa0] sm:$0xff]  ;;  %v524_v26 = vpack.c.bf16 %v36_v19, %v28_v18 }
   0x8   :  { %v41_v15 = vld [vmem:[%s964_s0 + $0xe8] sm:$0xff]  ;;  %553 = vmatpush1.bf16.xpose.msra.mxu0 %v552_v12  ;;  %v40_v21 = vld [vmem:[%s964_s0 + $0xe0] sm:$0xff] }
   0x9   :  { %v554_v17 = vpack.c.bf16 %v41_v15, %v33_v14  ;;  %523 = vmatprep.subr.bf16.mxu1 %v522_v16  ;;  %v45_v22 = vld [vmem:[%s964_s0 + $0x108] sm:$0xff]  ;;  %v556_v27 = vpack.c.bf16 %v40_v21, %v32_v20  ;;  %v44_v32 = vld [vmem:[%s964_s0 + $0x100] sm:$0xff] }
   0xa   :  { %v53_v23 = vld [vmem:[%s964_s0 + $0x148] sm:$0xff]  ;;  %v52_v33 = vld [vmem:[%s964_s0 + $0x140] sm:$0xff] }
   0xb   :  { %555 = vmatprep.subr.bf16.mxu0 %v554_v17  ;;  %v49_v24 = vld [vmem:[%s964_s0 + $0x128] sm:$0xff]  ;;  %v526_v28 = vpack.c.bf16 %v53_v23, %v45_v22  ;;  %v48_v34 = vld [vmem:[%s964_s0 + $0x120] sm:$0xff]  ;;  %v528_v40 = vpack.c.bf16 %v52_v33, %v44_v32 }
   0xc   :  { %v57_v25 = vld [vmem:[%s964_s0 + $0x168] sm:$0xff]  ;;  %v56_v35 = vld [vmem:[%s964_s0 + $0x160] sm:$0xff] }
   0xd   :  { %v558_v29 = vpack.c.bf16 %v57_v25, %v49_v24  ;;  %v77_v30 = vld [vmem:[%s965_s1 + $0x8] sm:$0xff]  ;;  %v560_v41 = vpack.c.bf16 %v56_v35, %v48_v34  ;;  %v60_v44 = vld [vmem:[%s964_s0 + $0x180] sm:$0xff] }
   0xe   :  { %156 = vmatprep.mubr.f32.mxu1 %v77_v30  ;;  %v81_v31 = vld [vmem:[%s965_s1 + $0x28] sm:$0xff]  ;;  %525 = vmatpush1.bf16.xpose.msra.mxu1 %v524_v26  ;;  %v68_v45 = vld [vmem:[%s964_s0 + $0x1c0] sm:$0xff] }
   0xf   :  { %306 = vmatprep.mubr.f32.mxu0 %v81_v31  ;;  %527 = vmatprep.subr.bf16.mxu1 %v526_v28  ;;  %v61_v36 = vld [vmem:[%s964_s0 + $0x188] sm:$0xff]  ;;  %v64_v46 = vld [vmem:[%s964_s0 + $0x1a0] sm:$0xff]  ;;  %v532_v52 = vpack.c.bf16 %v68_v45, %v60_v44 }
  0x10   :  { %557 = vmatpush1.bf16.xpose.msra.mxu0 %v556_v27  ;;  %v69_v37 = vld [vmem:[%s964_s0 + $0x1c8] sm:$0xff]  ;;  %v72_v47 = vld [vmem:[%s964_s0 + $0x1e0] sm:$0xff] }
  0x11   :  { %559 = vmatprep.subr.bf16.mxu0 %v558_v29  ;;  %v65_v38 = vld [vmem:[%s964_s0 + $0x1a8] sm:$0xff]  ;;  %v530_v42 = vpack.c.bf16 %v69_v37, %v61_v36  ;;  %v564_v53 = vpack.c.bf16 %v72_v47, %v64_v46 }
  0x12   :  { %v73_v39 = vld [vmem:[%s964_s0 + $0x1e8] sm:$0xff] }
  0x13   :  { %v562_v43 = vpack.c.bf16 %v73_v39, %v65_v38 }
  0x16   :  { %529 = vmatpush1.bf16.xpose.msra.mxu1 %v528_v40 }
  0x17   :  { %531 = vmatprep.subr.bf16.mxu1 %v530_v42 }
  0x18   :  { %561 = vmatpush1.bf16.xpose.msra.mxu0 %v560_v41 }
  0x19   :  { %563 = vmatprep.subr.bf16.mxu0 %v562_v43 }
  0x1a   :  { %7 = vsyncpa [#allocation3], 0  ;;  %v14_v56 = vld [vmem:[%s964_s0 + $0x10] sm:$0xff]  ;;  %v31_v60 = vld [vmem:[%s964_s0 + $0x98] sm:$0xff]  ;;  %v392_v48 = vlaneseq  ;;  %vm620_vm3 = vmmov 1  }
  0x1b   :  { %v22_v57 = vld [vmem:[%s964_s0 + $0x50] sm:$0xff]  ;;  %v39_v61 = vld [vmem:[%s964_s0 + $0xd8] sm:$0xff]  ;;  %v76_v0 = vld [vmem:[%s965_s1] sm:$0xff] }
  0x1c   :  { %v18_v58 = vld [vmem:[%s964_s0 + $0x30] sm:$0xff]  ;;  %v35_v62 = vld [vmem:[%s964_s0 + $0xb8] sm:$0xff]  ;;  %v536_v1 = vpack.c.bf16 %v22_v57, %v14_v56  ;;  %v80_v2 = vld [vmem:[%s965_s1 + $0x20] sm:$0xff]  ;;  %v538_v4 = vpack.c.bf16 %v39_v61, %v31_v60  ;;  %v393_v49 = vshrl.u32 %v392_v48, 7 }
  0x1d   :  { %v26_v59 = vld [vmem:[%s964_s0 + $0x70] sm:$0xff]  ;;  %v43_v63 = vld [vmem:[%s964_s0 + $0xf8] sm:$0xff]  ;;  %v85_v8 = vld [vmem:[%s965_s1 + $0x48] sm:$0xff] }
  0x1e   :  { %533 = vmatpush1.bf16.xpose.msra.mxu1 %v532_v52  ;;  %v568_v3 = vpack.c.bf16 %v26_v59, %v18_v58  ;;  %v570_v5 = vpack.c.bf16 %v43_v63, %v35_v62  ;;  %v30_v6 = vld [vmem:[%s964_s0 + $0x90] sm:$0xff]  ;;  %v89_v10 = vld [vmem:[%s965_s1 + $0x68] sm:$0xff]  ;;  %v84_v11 = vld [vmem:[%s965_s1 + $0x40] sm:$0xff]  ;;  %v394_v50 = vand.u32 1, %v393_v49  ;;  %v396_v51 = vand.u32 2, %v393_v49 }
  0x1f   :  { %535 = vmatprep.subr.bf16.mxu1 %v534_v54  ;;  %v38_v7 = vld [vmem:[%s964_s0 + $0xd0] sm:$0xff]  ;;  %v88_v13 = vld [vmem:[%s965_s1 + $0x60] sm:$0xff]  ;;  %v79_v14 = vld [vmem:[%s965_s1 + $0x18] sm:$0xff]  ;;  %v412_v58 = vand.u32 4, %v393_v49 }
  0x20   :  { %565 = vmatpush1.bf16.xpose.msra.mxu0 %v564_v53  ;;  %v34_v9 = vld [vmem:[%s964_s0 + $0xb0] sm:$0xff]  ;;  %v47_v15 = vld [vmem:[%s964_s0 + $0x118] sm:$0xff]  ;;  %v540_v20 = vpack.c.bf16 %v38_v7, %v30_v6  ;;  %vm877_vm0 = vcmp.eq.s32.totalorder %v394_v50, 0  ;;  %vm881_vm1 = vcmp.eq.s32.totalorder %v396_v51, 0 }
  0x21   :  { %567 = vmatprep.subr.bf16.mxu0 %v566_v55  ;;  %v42_v12 = vld [vmem:[%s964_s0 + $0xf0] sm:$0xff]  ;;  %v55_v16 = vld [vmem:[%s964_s0 + $0x158] sm:$0xff]  ;;  %vm398_vm2 = vmxor %vm877_vm0, %vm881_vm1  ;;  %vm896_vm5 = vcmp.eq.s32.totalorder %v412_v58, 0 }
  0x22   :  { %v83_v17 = vld [vmem:[%s965_s1 + $0x38] sm:$0xff]  ;;  %v572_v21 = vpack.c.bf16 %v42_v12, %v34_v9  ;;  %v542_v22 = vpack.c.bf16 %v55_v16, %v47_v15  ;;  %v46_v24 = vld [vmem:[%s964_s0 + $0x110] sm:$0xff]  ;;  %vm890_vm4 = vmxor %vm398_vm2, %vm620_vm3  ;;  %vm502_vm2 = vcmask 0  }
  0x23   :  { %v51_v18 = vld [vmem:[%s964_s0 + $0x138] sm:$0xff]  ;;  %v54_v25 = vld [vmem:[%s964_s0 + $0x150] sm:$0xff]  ;;  %vm414_vm6 = vmxor %vm881_vm1, %vm896_vm5 }
  0x24   :  { %v59_v19 = vld [vmem:[%s964_s0 + $0x178] sm:$0xff]  ;;  %v50_v26 = vld [vmem:[%s964_s0 + $0x130] sm:$0xff]  ;;  %v544_v32 = vpack.c.bf16 %v54_v25, %v46_v24  ;;  %vm909_vm7 = vmxor %vm414_vm6, %vm620_vm3 }
  0x25   :  { %157 = vmatmul.mubr.f32.vlgmr.msra.gmra.mrb[0].mxu1 %v76_v0  ;;  %v574_v23 = vpack.c.bf16 %v59_v19, %v51_v18  ;;  %v58_v27 = vld [vmem:[%s964_s0 + $0x170] sm:$0xff]  ;;  %v63_v28 = vld [vmem:[%s964_s0 + $0x198] sm:$0xff]  ;;  %vm428_vm8 = vmxor %vm877_vm0, %vm896_vm5 }
  0x26   :  { %537 = vmatpush1.bf16.xpose.msra.mxu1 %v536_v1  ;;  %161 = vmatprep.mubr.f32.mxu1 %v85_v8  ;;  %v71_v29 = vld [vmem:[%s964_s0 + $0x1d8] sm:$0xff]  ;;  %v576_v33 = vpack.c.bf16 %v58_v27, %v50_v26  ;;  %v62_v36 = vld [vmem:[%s964_s0 + $0x190] sm:$0xff]  ;;  %vm429_vm9 = vmxor %vm428_vm8, %vm620_vm3 }
  0x27   :  { %307 = vmatmul.mubr.f32.vlgmr.msra.gmra.mrb[0].mxu0 %v80_v2  ;;  %539 = vmatprep.subr.bf16.mxu1 %v538_v4  ;;  %v67_v30 = vld [vmem:[%s964_s0 + $0x1b8] sm:$0xff]  ;;  %v546_v34 = vpack.c.bf16 %v71_v29, %v63_v28  ;;  %v70_v37 = vld [vmem:[%s964_s0 + $0x1d0] sm:$0xff]  ;;  %vm444_vm10 = vmxor %vm896_vm5, %vm620_vm3 }
  0x28   :  { %569 = vmatpush1.bf16.xpose.msra.mxu0 %v568_v3  ;;  %311 = vmatprep.mubr.f32.mxu0 %v89_v10  ;;  %v75_v31 = vld [vmem:[%s964_s0 + $0x1f8] sm:$0xff]  ;;  %v66_v38 = vld [vmem:[%s964_s0 + $0x1b0] sm:$0xff]  ;;  %v548_v40 = vpack.c.bf16 %v70_v37, %v62_v36  ;;  %vm445_vm11 = vmxor %vm444_vm10, %vm620_vm3 }
  0x29   :  { %571 = vmatprep.subr.bf16.mxu0 %v570_v5  ;;  %162 = vmatmul.mubr.f32.gmra.mrb[2].mxu1 %v84_v11  ;;  %v578_v35 = vpack.c.bf16 %v75_v31, %v67_v30  ;;  %v74_v39 = vld [vmem:[%s964_s0 + $0x1f0] sm:$0xff]  ;;  %v87_v44 = vld [vmem:[%s965_s1 + $0x58] sm:$0xff]  ;;  %vm454_vm12 = vmxor %vm881_vm1, %vm620_vm3 }
  0x2a   :  { %231 = vmatprep.mubr.f32.mxu1 %v79_v14  ;;  %v580_v41 = vpack.c.bf16 %v74_v39, %v66_v38  ;;  %v78_v42 = vld [vmem:[%s965_s1 + $0x10] sm:$0xff]  ;;  %v91_v45 = vld [vmem:[%s965_s1 + $0x78] sm:$0xff]  ;;  %vm455_vm13 = vmxor %vm454_vm12, %vm620_vm3 }
  0x2b   :  { %312 = vmatmul.mubr.f32.gmra.mrb[2].mxu0 %v88_v13  ;;  %v82_v43 = vld [vmem:[%s965_s1 + $0x30] sm:$0xff]  ;;  %vm468_vm14 = vmxor %vm877_vm0, %vm620_vm3 }
  0x2c   :  { %381 = vmatprep.mubr.f32.mxu0 %v83_v17  ;;  %v86_v46 = vld [vmem:[%s965_s1 + $0x50] sm:$0xff]  ;;  %vm469_vm15 = vmxor %vm468_vm14, %vm620_vm3 }
  0x2d   :  { %v90_v47 = vld [vmem:[%s965_s1 + $0x70] sm:$0xff]  ;;  %s621_s1 = smov [#allocation2]  }
  0x2e   :  { %541 = vmatpush1.bf16.xpose.msra.mxu1 %v540_v20  ;;  %s510_s28 = sshll.u32 %s621_s1, 4  ;;  %s511_s28 = int_to_ptr.vmem [resolvable:$true] %s510_s28 }
  0x2f   :  { %543 = vmatprep.subr.bf16.mxu1 %v542_v22  ;;  %s596_s29 = scalar_lea.vmem %s511_s28, 16  ;;  %s600_s30 = scalar_lea.vmem %s511_s28, 32 }
  0x30   :  { %573 = vmatpush1.bf16.xpose.msra.mxu0 %v572_v21  ;;  %p597_p0 = scmp.ne.s32.totalorder %s511_s28, %s596_s29  ;;  %p601_p1 = scmp.lt.s32.totalorder %s511_s28, %s511_s28 }
  0x31   :  { %575 = vmatprep.subr.bf16.mxu0 %v574_v23  ;;  %p602_p2 = scmp.lt.s32.totalorder %s600_s30, %s596_s29 }
  0x33   :  { %p603_p3 = por %p602_p2, %p601_p1 }
  0x35   :  { %p604_p4 = pnand %p603_p3, %p597_p0 }
  0x36   :  { %545 = vmatpush1.bf16.xpose.msra.mxu1 %v544_v32 }
  0x37   :  { %547 = vmatprep.subr.bf16.mxu1 %v546_v34 }
  0x38   :  { %577 = vmatpush1.bf16.xpose.msra.mxu0 %v576_v33 }
  0x39   :  { %579 = vmatprep.subr.bf16.mxu0 %v578_v35 }
  0x3e   :  { %549 = vmatpush1.bf16.xpose.msra.mxu1 %v548_v40 }
  0x40   :  { %581 = vmatpush1.bf16.xpose.msra.mxu0 %v580_v41 }
  0x45   :  { %232 = vmatmul.mubr.f32.vlgmr.msra.gmra.mrb[0].mxu1 %v78_v42 }
  0x46   :  { %236 = vmatprep.mubr.f32.mxu1 %v87_v44 }
  0x47   :  { %382 = vmatmul.mubr.f32.vlgmr.msra.gmra.mrb[0].mxu0 %v82_v43 }
  0x48   :  { %386 = vmatprep.mubr.f32.mxu0 %v91_v45 }
  0x49   :  { %237 = vmatmul.mubr.f32.gmra.mrb[2].mxu1 %v86_v46 }
  0x4b   :  { %387 = vmatmul.mubr.f32.gmra.mrb[2].mxu0 %v90_v47 }
 0x118   :  { %v233_v52 = vpop.f32.mrb[0].mxu1 }
 0x119   :  { %v235_v56 = vpop.f32.mrb[1].mxu1 }
 0x11a   :  { %v383_v55 = vpop.f32.mrb[0].mxu0 }
 0x11b   :  { %v582_v57 = vadd.f32 %v383_v55, %v233_v52  ;;  %v385_v59 = vpop.f32.mrb[1].mxu0 }
 0x11c   :  { %v238_v62 = vpop.f32.mrb[2].mxu1 }
 0x11d   :  { %v400_v60 = vrot.slane %v582_v57, 1  ;;  %v401_v61 = vrot.slane %v582_v57, 7  ;;  %v240_v0 = vpop.f32.mrb[3].mxu1 }
 0x11e   :  { %v388_v63 = vpop.f32.mrb[2].mxu0 }
 0x11f   :  { %v402_v2 = vsel %vm877_vm0, %v400_v60, %v401_v61  ;;  %v583_v4 = vadd.f32 %v388_v63, %v238_v62  ;;  %v390_v5 = vpop.f32.mrb[3].mxu0 }
 0x120   :  { %v403_v6 = vmin.f32 %v582_v57, %v402_v2  ;;  %v404_v7 = vmax.f32 %v582_v57, %v402_v2 }
 0x121   :  { %v406_v8 = vrot.slane %v583_v4, 1  ;;  %v407_v9 = vrot.slane %v583_v4, 7 }
 0x122   :  { %v405_v10 = vsel %vm890_vm4, %v403_v6, %v404_v7 }
 0x123   :  { %v416_v11 = vrot.slane %v405_v10, 2  ;;  %v417_v12 = vrot.slane %v405_v10, 6  ;;  %v408_v13 = vsel %vm877_vm0, %v406_v8, %v407_v9 }
 0x124   :  { %v409_v14 = vmin.f32 %v583_v4, %v408_v13  ;;  %v410_v15 = vmax.f32 %v583_v4, %v408_v13 }
 0x125   :  { %v418_v17 = vsel %vm881_vm1, %v416_v11, %v417_v12 }
 0x126   :  { %v419_v18 = vmin.f32 %v405_v10, %v418_v17  ;;  %v420_v19 = vmax.f32 %v405_v10, %v418_v17  ;;  %v411_v20 = vsel %vm890_vm4, %v409_v14, %v410_v15 }
 0x127   :  { %v422_v21 = vrot.slane %v411_v20, 2  ;;  %v423_v22 = vrot.slane %v411_v20, 6 }
 0x128   :  { %v421_v23 = vsel %vm909_vm7, %v419_v18, %v420_v19 }
 0x129   :  { %v430_v24 = vrot.slane %v421_v23, 1  ;;  %v431_v25 = vrot.slane %v421_v23, 7  ;;  %v424_v26 = vsel %vm881_vm1, %v422_v21, %v423_v22 }
 0x12a   :  { %v425_v27 = vmin.f32 %v411_v20, %v424_v26  ;;  %v426_v28 = vmax.f32 %v411_v20, %v424_v26 }
 0x12b   :  { %v432_v29 = vsel %vm877_vm0, %v430_v24, %v431_v25 }
 0x12c   :  { %v433_v30 = vmin.f32 %v421_v23, %v432_v29  ;;  %v434_v31 = vmax.f32 %v421_v23, %v432_v29  ;;  %v427_v32 = vsel %vm909_vm7, %v425_v27, %v426_v28 }
 0x12d   :  { %v436_v33 = vrot.slane %v427_v32, 1  ;;  %v437_v34 = vrot.slane %v427_v32, 7 }
 0x12e   :  { %v435_v35 = vsel %vm429_vm9, %v433_v30, %v434_v31 }
 0x12f   :  { %v438_v36 = vsel %vm877_vm0, %v436_v33, %v437_v34  ;;  %v446_v37 = vrot.slane %v435_v35, 4 }
 0x130   :  { %v439_v38 = vmin.f32 %v427_v32, %v438_v36  ;;  %v440_v39 = vmax.f32 %v427_v32, %v438_v36 }
 0x131   :  { %v447_v40 = vmin.f32 %v435_v35, %v446_v37  ;;  %v448_v41 = vmax.f32 %v435_v35, %v446_v37 }
 0x132   :  { %v441_v42 = vsel %vm429_vm9, %v439_v38, %v440_v39 }
 0x133   :  { %v449_v43 = vsel %vm445_vm11, %v447_v40, %v448_v41  ;;  %v450_v44 = vrot.slane %v441_v42, 4 }
 0x134   :  { %v456_v45 = vrot.slane %v449_v43, 2  ;;  %v457_v46 = vrot.slane %v449_v43, 6 }
 0x135   :  { %v451_v47 = vmin.f32 %v441_v42, %v450_v44  ;;  %v452_v48 = vmax.f32 %v441_v42, %v450_v44 }
 0x136   :  { %v458_v49 = vsel %vm881_vm1, %v456_v45, %v457_v46 }
 0x137   :  { %v453_v50 = vsel %vm445_vm11, %v451_v47, %v452_v48  ;;  %v459_v51 = vmin.f32 %v449_v43, %v458_v49  ;;  %v460_v52 = vmax.f32 %v449_v43, %v458_v49 }
 0x138   :  { %v462_v55 = vrot.slane %v453_v50, 2  ;;  %v463_v56 = vrot.slane %v453_v50, 6 }
 0x139   :  { %v461_v57 = vsel %vm455_vm13, %v459_v51, %v460_v52 }
 0x13a   :  { %v464_v58 = vsel %vm881_vm1, %v462_v55, %v463_v56  ;;  %v470_v59 = vrot.slane %v461_v57, 1  ;;  %v471_v60 = vrot.slane %v461_v57, 7  ;;  %vm484_vm1 = vcmask 523264  }
 0x13b   :  { %v465_v61 = vmin.f32 %v453_v50, %v464_v58  ;;  %v466_v62 = vmax.f32 %v453_v50, %v464_v58 }
 0x13c   :  { %v472_v63 = vsel %vm877_vm0, %v470_v59, %v471_v60 }
 0x13d   :  { %v467_v0 = vsel %vm455_vm13, %v465_v61, %v466_v62  ;;  %v473_v3 = vmin.f32 %v461_v57, %v472_v63  ;;  %v474_v4 = vmax.f32 %v461_v57, %v472_v63 }
 0x13e   :  { %v476_v1 = vrot.slane %v467_v0, 1  ;;  %v477_v2 = vrot.slane %v467_v0, 7 }
 0x13f   :  { %v475_v7 = vsel %vm469_vm15, %v473_v3, %v474_v4 }
 0x140   :  { %v478_v54 = vsel %vm877_vm0, %v476_v1, %v477_v2 }
 0x141   :  { %v479_v5 = vmin.f32 %v467_v0, %v478_v54  ;;  %v480_v6 = vmax.f32 %v467_v0, %v478_v54 }
 0x143   :  { %v481_v8 = vsel %vm469_vm15, %v479_v5, %v480_v6 }
 0x144   :  { %v482_v9 = vsub.f32 %v475_v7, %v481_v8 }
 0x146   :  { %v483_v10 = vmul.f32 %v482_v9, %v482_v9 }
 0x148   :  { %v485_v11 = vsel %vm484_vm1, %v483_v10, 0.0 }
 0x149   :  { %486 = vadd.xlane.f32.xlu0 %v485_v11 }
 0x1d6   :  { %v487_v12 = vpop.xlane.xlu0 %486 }
 0x1d7   :  { %v488_v13 = vrot.slane %v487_v12, 4 }
 0x1d9   :  { %v489_v14 = vadd.f32 %v488_v13, %v487_v12 }
 0x1db   :  { %v490_v15 = vrot.slane %v489_v14, 2 }
 0x1dd   :  { %v491_v16 = vadd.f32 %v490_v15, %v489_v14 }
 0x1df   :  { %v492_v17 = vrot.slane %v491_v16, 1 }
 0x1e1   :  { %v493_v18 = vadd.f32 %v492_v17, %v491_v16 }
 0x1e3   :  { %v494_v19 = vmul.f32 0.001953125, %v493_v18 }
 0x1e5   :  { %594 = vrsqrt.f32 %v494_v19  ;;  %vm497_vm0 = vcmp.eq.f32.partialorder %v494_v19, inf  ;;  %v500_v21 = vand.u32 2147483648, %v494_v19  ;;  %vm499_vm3 = vcmp.eq.f32.partialorder %v494_v19, 0.0 }
 0x1ef   :  { %v595_v53 = vpop.eup %594 }
 0x1f0   :  { %v496_v20 = vmul.f32 %v595_v53, %v494_v19 }
 0x1f2   :  { %v498_v22 = vsel %vm497_vm0, %v494_v19, %v496_v20 }
 0x1f3   :  { %v501_v23 = vsel %vm499_vm3, %v500_v21, %v498_v22 }
 0x1f4   :  { %503 = vst.msk [vmem:[#allocation2] sm:$0x1] %vm502_vm2, %v501_v23 }
 0x1f5   :  { %607 = shalt.err (!%p604_p4)
}
 0x1f6   :  { %s608_s5 = scalar_lea.hbm %s966_s2, 16 }
 0x1f7   :  { %p609_p5 = scmp.ne.s32.totalorder %s966_s2, %s608_s5  ;;  %p612_p6 = scmp.lt.u32.totalorder %s608_s5, %s966_s2 }
 0x1f9   :  { %p614_p7 = pnand %p612_p6, %p609_p5 }
 0x1fb   :  { %617 = shalt.err (!%p614_p7)
}
 0x1fc   :  { %513 = dma.vmem_to_hbm [thread:$0]  %s511_s28, 16, %s966_s2, [#allocation3]  }
 0x1fd   :  { %618 = dma.done.wait [#allocation3], 16  }
 0x1fe   :  { %619 = vsyncadd [#allocation3], 4294967280 }
 0x1ff   :  { %517 = vsyncpa [#allocation3], 1 }

</bundles_post_ra>
